<compile_context>
chip_gen: v5e
topology: v5e:2x2
jax: 0.10.0
libtpu: 0.0.40
codegen_flags: <defaults>
</compile_context>

<pallas_src>
import jax
import jax.numpy as jnp
from jax.experimental import pallas as pl
from jax.experimental.pallas import tpu as pltpu

# Head layout in the fused weight matrix: (name, out_dim)
HEADS = [
    ("distance_score", 1), ("distance_confidence", 1),
    ("object_score", 1), ("object_confidence", 1),
    ("expanse_score", 1), ("expanse_confidence", 1),
    ("facingness_score", 1), ("facingness_confidence", 1),
    ("communicating_score", 1), ("communicating_confidence", 1),
    ("joint_score", 1), ("joint_confidence", 1),
    ("valence_score", 1), ("valence_confidence", 1),
    ("arousal_score", 1), ("arousal_confidence", 1),
    ("location_score", 1), ("location_confidence", 1),
    ("peoplecount", 5), ("peoplecount_certain", 1),
]
N_OUT = sum(d for _, d in HEADS)  # 24 real output columns
N_PAD = 128                       # lane-dense fused output width


def _multihead_kernel(x_ref, w_ref, b_ref, o_ref):
    # x_ref: [TB, F] (native dtype), w_ref: [F, N_PAD] (resident, same dtype as x),
    # b_ref: [1, N_PAD] f32 (resident), o_ref: [TB, N_PAD] (x dtype).
    acc = jnp.dot(x_ref[...], w_ref[...], preferred_element_type=jnp.float32)
    o_ref[...] = (acc + b_ref[...]).astype(o_ref.dtype)


def _vmem_budget_bytes():
    """Generation-aware VMEM budget: ~96 MiB on 128-MiB parts (v5e/v6e),
    ~40 MiB on 64-MiB parts (v7x).  Falls back to the v7x-safe budget."""
    cap = None
    try:
        cap = getattr(pltpu.get_tpu_info(), "vmem_capacity_bytes", None)
    except Exception:
        cap = None
    if cap is None:
        cap = 64 << 20
    return (96 << 20) if cap >= (100 << 20) else (40 << 20)


def _choose_batch_tile(B, F, x_itemsize, o_itemsize, vmem_budget):
    """Byte-targeted batch tile: ~4 MiB x-tile (>=512 rows), clamped so that
    double-buffered x/out tiles + resident W/bias fit the VMEM budget."""
    sublane = 8 if x_itemsize >= 4 else 16          # f32: 8, bf16: 16 (packing)
    resident = 2 * F * N_PAD * x_itemsize + 2 * N_PAD * 4   # W + bias (double-buffered)
    per_row = 2 * (F * x_itemsize + N_PAD * o_itemsize)     # x row + out row, x2 buffers
    tb_max = max(sublane, (vmem_budget - resident) // per_row)
    target_x_bytes = 4 << 20                        # ~4 MiB x tile amortizes grid-step cost
    tb = min(tb_max, max(512, target_x_bytes // max(1, F * x_itemsize)))
    if B <= tb:
        return B                                    # single tile; block == full dim is legal
    return max(sublane, (int(tb) // sublane) * sublane)


def pad_params(w_all, b_all, compute_dtype=jnp.float32):
    """Build the lane-padded fused weight/bias ONCE (hoisted out of forward).
    w_all: [F, 24], b_all: [24]  ->  w_pad: [F, 128] compute_dtype, b_pad: [1, 128] f32."""
    F = w_all.shape[0]
    w_pad = jnp.zeros((F, N_PAD), compute_dtype).at[:, :N_OUT].set(
        w_all.astype(compute_dtype))
    b_pad = jnp.zeros((1, N_PAD), jnp.float32).at[0, :N_OUT].set(
        b_all.astype(jnp.float32))
    return w_pad, b_pad


def multihead_linear(x, w_pad, b_pad):
    """Fused 20-head linear. x: [B, F] (f32 or bf16), w_pad: [F, 128], b_pad: [1, 128].
    Returns dict of per-head outputs in x.dtype."""
    B, F = x.shape
    assert w_pad.shape == (F, N_PAD), w_pad.shape
    assert b_pad.shape == (1, N_PAD), b_pad.shape

    # Never upcast the big streamed operand; cast the small W to match x instead.
    if w_pad.dtype != x.dtype:
        w_pad = w_pad.astype(x.dtype)
    out_dtype = x.dtype
    x_bytes = jnp.dtype(x.dtype).itemsize
    o_bytes = jnp.dtype(out_dtype).itemsize

    vmem_budget = _vmem_budget_bytes()
    TB = _choose_batch_tile(B, F, x_bytes, o_bytes, vmem_budget)

    # Scoped-VMEM limit: this tiling + 50% headroom, clamped to the generation budget.
    vmem_needed = (2 * TB * F * x_bytes + 2 * F * N_PAD * x_bytes
                   + 2 * N_PAD * 4 + 2 * TB * N_PAD * o_bytes)
    vmem_limit = int(min(max(vmem_needed * 3 // 2 + (1 << 20), 16 << 20), vmem_budget))

    fused = pl.pallas_call(
        _multihead_kernel,
        out_shape=jax.ShapeDtypeStruct((B, N_PAD), out_dtype),
        grid_spec=pltpu.PrefetchScalarGridSpec(
            num_scalar_prefetch=0,
            grid=(pl.cdiv(B, TB),),
            in_specs=[
                pl.BlockSpec((TB, F), lambda i: (i, 0)),       # x: streamed per tile
                pl.BlockSpec((F, N_PAD), lambda i: (0, 0)),    # W: resident across grid
                pl.BlockSpec((1, N_PAD), lambda i: (0, 0)),    # bias: resident across grid
            ],
            out_specs=pl.BlockSpec((TB, N_PAD), lambda i: (i, 0)),
        ),
        compiler_params=pltpu.CompilerParams(
            dimension_semantics=("parallel",),   # lets v7x shard batch across 2 TCs
            vmem_limit_bytes=vmem_limit,
        ),
        cost_estimate=pl.CostEstimate(
            flops=2 * B * F * N_PAD,
            transcendentals=0,
            bytes_accessed=(B * F * x_bytes + F * N_PAD * x_bytes
                            + N_PAD * 4 + B * N_PAD * o_bytes),
        ),
    )(x, w_pad, b_pad)

    # Split the padded slab directly per head; the 104-wide zero tail piece is
    # simply discarded (no intermediate (B, 24) materialization).
    split_points, off = [], 0
    for _, d in HEADS:
        off += d
        split_points.append(off)
    pieces = jnp.split(fused, split_points, axis=1)
    return {name: piece for (name, _), piece in zip(HEADS, pieces)}


def init_params(key, in_features):
    """Deterministic synthetic init, PyTorch Linear style U(-1/sqrt(F), 1/sqrt(F))."""
    kw, kb = jax.random.split(key)
    bound = 1.0 / (in_features ** 0.5)
    w_all = jax.random.uniform(
        kw, (in_features, N_OUT), jnp.float32, minval=-bound, maxval=bound)
    b_all = jax.random.uniform(
        kb, (N_OUT,), jnp.float32, minval=-bound, maxval=bound)
    return w_all, b_all


if __name__ == "__main__":
    key = jax.random.PRNGKey(0)
    kx, kp = jax.random.split(key)

    batch = 2
    in_features = 32
    x = jax.random.normal(kx, (batch, in_features), jnp.float32)
    w_all, b_all = init_params(kp, in_features)

    fwd = jax.jit(multihead_linear)

    # --- f32 path ---------------------------------------------------------
    w_pad, b_pad = pad_params(w_all, b_all, jnp.float32)   # padded once, outside forward
    outputs = jax.block_until_ready(fwd(x, w_pad, b_pad))

    ref = x @ w_all + b_all
    off = 0
    for name, d in HEADS:
        assert outputs[name].shape == (batch, d), (name, outputs[name].shape)
        assert jnp.allclose(outputs[name], ref[:, off:off + d],
                            atol=1e-5, rtol=1e-5), name
        off += d

    # --- bf16 streaming path (halves HBM bytes on the dominant x stream) ---
    x_bf = x.astype(jnp.bfloat16)
    w_pad_bf, b_pad_bf = pad_params(w_all, b_all, jnp.bfloat16)
    outputs_bf = jax.block_until_ready(fwd(x_bf, w_pad_bf, b_pad_bf))

    ref_bf = (x_bf.astype(jnp.float32) @ w_pad_bf[:, :N_OUT].astype(jnp.float32)
              + b_all).astype(jnp.bfloat16)
    off = 0
    for name, d in HEADS:
        assert outputs_bf[name].shape == (batch, d), (name, outputs_bf[name].shape)
        assert outputs_bf[name].dtype == jnp.bfloat16
        assert jnp.allclose(outputs_bf[name].astype(jnp.float32),
                            ref_bf[:, off:off + d].astype(jnp.float32),
                            atol=3e-2, rtol=3e-2), name
        off += d

    print("KERNEL_OK")
</pallas_src>

<mosaic_0001>
module attributes {stable_mosaic.version = 11 : i64} {
  func.func @_multihead_kernel(%arg0: i32, %arg1: memref<2x32xf32, #tpu.memory_space<vmem>>, %arg2: memref<32x128xf32, #tpu.memory_space<vmem>>, %arg3: memref<1x128xf32, #tpu.memory_space<vmem>>, %arg4: memref<2x128xf32, #tpu.memory_space<vmem>>) attributes {dimension_semantics = [#tpu.dimension_semantics<parallel>], iteration_bounds = array<i64: 1>, scalar_prefetch = 0 : i64, scratch_operands = 0 : i64, tpu.core_type = #tpu.core_type<tc>, window_params = [{transform_indices = @transform_0, window_bounds = array<i64: 2, 32>}, {pipeline_mode = #tpu.pipeline_mode<synchronous>, transform_indices = @transform_1, window_bounds = array<i64: 32, 128>}, {pipeline_mode = #tpu.pipeline_mode<synchronous>, transform_indices = @transform_2, window_bounds = array<i64: 1, 128>}, {transform_indices = @transform_3, window_bounds = array<i64: 2, 128>}]} {
    %c0 = arith.constant 0 : index
    %c0_0 = arith.constant 0 : index
    %0 = vector.load %arg1[%c0, %c0_0] : memref<2x32xf32, #tpu.memory_space<vmem>>, vector<2x32xf32>
    %c0_1 = arith.constant 0 : index
    %c0_2 = arith.constant 0 : index
    %1 = vector.load %arg2[%c0_1, %c0_2] : memref<32x128xf32, #tpu.memory_space<vmem>>, vector<32x128xf32>
    %cst = arith.constant dense<0.000000e+00> : vector<2x128xf32>
    %2 = tpu.matmul %0, %1, %cst {dimension_numbers = #tpu.dot_dimension_numbers<[1], [0], [0], [1], [0, 0, 1, 1], [], []>} : vector<2x32xf32>, vector<32x128xf32>, vector<2x128xf32> -> vector<2x128xf32>
    %c0_3 = arith.constant 0 : index
    %c0_4 = arith.constant 0 : index
    %3 = vector.load %arg3[%c0_3, %c0_4] : memref<1x128xf32, #tpu.memory_space<vmem>>, vector<1x128xf32>
    %4 = vector.broadcast %3 : vector<1x128xf32> to vector<2x128xf32>
    %5 = arith.addf %2, %4 : vector<2x128xf32>
    %c0_5 = arith.constant 0 : index
    %c0_6 = arith.constant 0 : index
    %6 = vector.load %arg4[%c0_5, %c0_6] : memref<2x128xf32, #tpu.memory_space<vmem>>, vector<2x128xf32>
    tpu.vector_store %arg4[%c0_5, %c0_6], %5 {strides = array<i32>} : memref<2x128xf32, #tpu.memory_space<vmem>>, vector<2x128xf32>,
    return
  }
  func.func @transform_0(%arg0: i32) -> (i32, i32) {
    %c0_i32 = arith.constant 0 : i32
    %c0_i32_0 = arith.constant 0 : i32
    return %arg0, %c0_i32 : i32, i32
  }
  func.func @transform_1(%arg0: i32) -> (i32, i32) {
    %c0_i32 = arith.constant 0 : i32
    %c0_i32_0 = arith.constant 0 : i32
    %c0_i32_1 = arith.constant 0 : i32
    return %c0_i32, %c0_i32_0 : i32, i32
  }
  func.func @transform_2(%arg0: i32) -> (i32, i32) {
    %c0_i32 = arith.constant 0 : i32
    %c0_i32_0 = arith.constant 0 : i32
    %c0_i32_1 = arith.constant 0 : i32
    return %c0_i32, %c0_i32_0 : i32, i32
  }
  func.func @transform_3(%arg0: i32) -> (i32, i32) {
    %c0_i32 = arith.constant 0 : i32
    %c0_i32_0 = arith.constant 0 : i32
    return %arg0, %c0_i32 : i32, i32
  }
}

</mosaic_0001>

<bundles_post_ra>
// kernel: split.38
= control target key start
LH: loop header
LB: loop body
LE: loop exit
PB: predicated region body
PF: predicated region fallthrough
CT: control target
= control target key end

     0   :  { %v4_v0 = vlaneseq  ;;  %s69_s0 = inlined_call_operand.vmem [shape: f32[2,128], index: 0, kind: input, shape index: {}]   ;;  %s70_s1 = inlined_call_operand.hbm [shape: f32[2,5], index: 1, kind: output, shape index: {}]  }
   0x1   :  { %2 = vsyncpa [#allocation6], 0  ;;  %v3_v1 = vld [vmem:[%s69_s0] sm:$0x3]  ;;  %s51_s0 = smov 110   ;;  %s52_s8 = smov [#allocation5]  }
   0x2   :  { %v5_v2 = vand.u32 127, %v4_v0  ;;  %s14_s9 = sshll.u32 %s52_s8, 4  ;;  %s16_s1 = sshll.u32 %s70_s1, 4  ;;  %s15_s9 = int_to_ptr.vmem [resolvable:$true] %s14_s9  ;;  %s17_s1 = int_to_ptr.hbm [resolvable:$true] %s16_s1 }
   0x4   :  { %vm6_vm0 = vcmp.lt.s32.totalorder %v5_v2, 18 }
   0x5   :  { %v7_v3 = vsel %vm6_vm0, 0, %v3_v1 }
   0x6   :  { %8 = vrot.lane.b32.xlu0 %v7_v3, %s51_s0 }
  0x78   :  { %v9_v4 = vpop.permute.xlu0 %8 }
  0x79   :  { %10 = vst [vmem:[#allocation5] sm:$0x3] %v9_v4 }
  0x7a   :  { %19 = dma.vmem_to_hbm [thread:$0]  %s15_s9, 32, %s17_s1, [#allocation6]  }
  0x7b   :  { %49 = dma.done.wait [#allocation6], 32  }
  0x7c   :  { %50 = vsyncadd [#allocation6], 4294967264 }
  0x7d   :  { %22 = vsyncpa [#allocation6], 1 }

// kernel: multihead_linear.1
= control target key start
LH: loop header
LB: loop body
LE: loop exit
PB: predicated region body
PF: predicated region fallthrough
CT: control target
= control target key end

     0   :  { %8 = vsyncpa [#allocation3], 0  ;;  %s178_s0 = inlined_call_operand.hbm [shape: f32[2,32], index: 0, kind: input, shape index: {}]   ;;  %s179_s1 = inlined_call_operand.hbm [shape: f32[32,128], index: 1, kind: input, shape index: {}]   ;;  %s180_s2 = inlined_call_operand.vmem [shape: f32[1,128], index: 2, kind: input, shape index: {}]   ;;  %s181_s3 = inlined_call_operand.vmem [shape: f32[2,128], index: 3, kind: output, shape index: {}]  }
   0x1   :  { %s15_s14 = sshll.u32 %s178_s0, 4  ;;  %s16_s14 = int_to_ptr.hbm [resolvable:$true] %s15_s14 }
   0x2   :  { %9 = vsyncpa [#allocation5], 0  ;;  %s142_s15 = smov [#allocation2]   ;;  %s25_s19 = sshll.u32 %s179_s1, 4  ;;  %s26_s19 = int_to_ptr.hbm [resolvable:$true] %s25_s19 }
   0x3   :  { %s17_s16 = sshll.u32 %s142_s15, 4  ;;  %s143_s20 = smov [#allocation4]   ;;  %s18_s16 = int_to_ptr.vmem [resolvable:$true] %s17_s16 }
   0x4   :  { %20 = dma.hbm_to_vmem [thread:$0]  %s16_s14, 32, %s18_s16, [#allocation3]  }
   0x5   :  { %s27_s21 = sshll.u32 %s143_s20, 4  ;;  %s144_s22 = smov 128   ;;  %s28_s21 = int_to_ptr.vmem [resolvable:$true] %s27_s21 }
   0x6   :  { %s145_s23 = smov 8  }
   0x7   :  { %33 = dma.hbm_to_vmem [thread:$0]  %s26_s19, 512, %s28_s21, [#allocation5], %s144_s22, %s144_s22, %s145_s23  }
   0x8   :  { %138 = dma.done.wait [#allocation3], 32  }
   0x9   :  { %139 = vsyncadd [#allocation3], 4294967264 }
   0xa   :  { %140 = dma.done.wait [#allocation5], 512  }
   0xb   :  { %141 = vsyncadd [#allocation5], 4294966784  ;;  %v48_v0 = vld [vmem:[#allocation4 + $0x18] sm:$0xff]  ;;  %v47_v1 = vld [vmem:[#allocation4 + $0x10] sm:$0xff]  ;;  %vm53_vm0 = vcmask 261120  }
   0xc   :  { %69 = vmatpush.msra.mxu0 %v48_v0  ;;  %v46_v2 = vld [vmem:[#allocation4 + $0x8] sm:$0xff]  ;;  %v45_v3 = vld [vmem:[#allocation4] sm:$0xff]  ;;  %v44_v4 = vld [vmem:[#allocation2] sm:$0x3] }
   0xd   :  { %v89_v5 = vld [vmem:[%s180_s2] ss:$0 sm:$0xff] }
   0xe   :  { %70 = vmatpush.msra.mxu0 %v47_v1 }
  0x10   :  { %71 = vmatpush.msra.mxu0 %v46_v2 }
  0x12   :  { %72 = vmatpush.msra.mxu0 %v45_v3 }
  0x13   :  { %84 = vmatmul.msk.f32.vlgmr.msra.gmra.mxu0 %vm53_vm0, %v44_v4 }
  0x90   :  { %v74_v6 = vpop.f32.mrf.mxu0 }
  0x91   :  { %v75_v7 = vadd.f32 %v89_v5, %v74_v6 }
  0x93   :  { %77 = vst [vmem:[%s181_s3] sm:$0x3] %v75_v7 }
  0x94   :  { %82 = vsyncpa [#allocation3], 1 }
  0x95   :  { %83 = vsyncpa [#allocation5], 1 }

</bundles_post_ra>
